<compile_context>
chip_gen: v7x
topology: tpu7x:2x2x1
jax: 0.10.0
libtpu: 0.0.40
codegen_flags: <defaults>
</compile_context>

<pallas_src>
import functools

import jax
import jax.numpy as jnp
from jax import lax
from jax.experimental import pallas as pl
from jax.experimental.pallas import tpu as pltpu

_LANES = 128
_SUBLANES = 8
_NUM_CORES = 2  # leading "parallel" grid axis: uses both TCs on v7x, harmless on v5e/v6e


def _tile_config():
    """(max_tile_rows, vmem_limit_bytes) — bigger tiles on v7x (3.2 TB/s HBM)."""
    try:
        kind = jax.devices()[0].device_kind.lower()
    except Exception:  # pragma: no cover - defensive
        kind = ""
    if "v7" in kind or "7x" in kind:
        # 4 MiB/input/buffer (f32) -> 24 MiB double-buffered; v7x VMEM is 64 MiB.
        return 8192, 48 * 1024 * 1024
    # 2 MiB/input/buffer (f32) -> 12 MiB double-buffered; fits every generation.
    return 4096, 32 * 1024 * 1024


def _vfl_kernel(pred_ref, gt_ref, label_ref, acc_ref, *,
                alpha, gamma, rows, tile_rows, tiles_per_core):
    c = pl.program_id(0)   # core / partial-sum index ("parallel")
    i = pl.program_id(1)   # row-tile index            ("arbitrary")

    # Init this core's resident (8,128) partial-sum block on its first step.
    @pl.when(i == 0)
    def _():
        acc_ref[...] = jnp.zeros_like(acc_ref)

    # Compute in f32 (torch does pred_score.float() inside the autocast-off
    # block); inputs stream in whatever (possibly bf16) dtype the caller used.
    p = pred_ref[...].astype(jnp.float32)
    g = gt_ref[...].astype(jnp.float32)
    lb = label_ref[...].astype(jnp.float32)

    log_p_raw = jnp.log(p)
    if gamma == 2.0:                       # common case: avoid pow()
        p_pow = p * p
    else:
        # Reuse log(p): pow = exp(gamma * log p) -> one EUP op instead of two.
        p_pow = jnp.exp(gamma * log_p_raw)
    weight = alpha * p_pow * (1.0 - lb) + g * lb

    # torch binary_cross_entropy clamps the log terms at -100.
    log_p = jnp.maximum(log_p_raw, -100.0)
    log_1mp = jnp.maximum(jnp.log(1.0 - p), -100.0)
    bce = -(g * log_p + (1.0 - g) * log_1mp)

    contrib = bce * weight

    # Mask rows beyond the logical end of the data: the last block of each
    # core can be partial (or entirely out of range when this core's tile was
    # clamped to the last real block), and its VMEM tail contents are junk.
    row_in_tile = lax.broadcasted_iota(jnp.int32, (tile_rows, _LANES), 0)
    start_row = (c * tiles_per_core + i) * tile_rows
    contrib = jnp.where(row_in_tile < rows - start_row, contrib, 0.0)

    # Sublane-group reduction only (pure VPU vreg adds, no cross-lane XLU);
    # the resident (8,128) output block is the per-core partial accumulator.
    acc_ref[...] += contrib.reshape(
        tile_rows // _SUBLANES, _SUBLANES, _LANES).sum(axis=0)


def varifocal_loss(pred_score, gt_score, label, alpha=0.75, gamma=2.0):
    """Pallas implementation of VarifocalLoss.forward. Returns a scalar (f32)."""
    n = pred_score.size
    lane_pad = (-n) % _LANES

    def prep(x, fill):
        x = jnp.ravel(x)                     # keep caller dtype (bf16 stays bf16)
        if lane_pad:
            # Minimal pad so the flat array reshapes to (rows, 128). Fill values
            # chosen so weight == 0 on padded elements -> zero contribution.
            x = jnp.pad(x, (0, lane_pad), constant_values=fill)
        return x.reshape(-1, _LANES)

    p = prep(pred_score, 0.5)
    g = prep(gt_score, 0.0)
    lb = prep(label, 1.0)

    rows = p.shape[0]
    max_tile_rows, vmem_limit = _tile_config()
    tile_rows = min(max_tile_rows,
                    ((rows + _SUBLANES - 1) // _SUBLANES) * _SUBLANES)
    num_tiles = -(-rows // tile_rows)
    tiles_per_core = -(-num_tiles // _NUM_CORES)

    def in_map(c, i):
        # Clamp so a core with fewer tiles re-reads the last real block instead
        # of DMA-ing out of bounds; the in-kernel row mask zeroes it out.
        return (jnp.minimum(c * tiles_per_core + i, num_tiles - 1), 0)

    kernel = functools.partial(
        _vfl_kernel, alpha=float(alpha), gamma=float(gamma), rows=rows,
        tile_rows=tile_rows, tiles_per_core=tiles_per_core)

    out = pl.pallas_call(
        kernel,
        out_shape=jax.ShapeDtypeStruct((_NUM_CORES * _SUBLANES, _LANES),
                                       jnp.float32),
        grid=(_NUM_CORES, tiles_per_core),
        in_specs=[pl.BlockSpec((tile_rows, _LANES), in_map)] * 3,
        out_specs=pl.BlockSpec((_SUBLANES, _LANES), lambda c, i: (c, 0)),
        compiler_params=pltpu.CompilerParams(
            dimension_semantics=("parallel", "arbitrary"),
            vmem_limit_bytes=vmem_limit),
    )(p, g, lb)

    # Tiny (16, 128) cross-lane/core reduction outside the kernel.
    return jnp.sum(out)


def varifocal_loss_ref(pred_score, gt_score, label, alpha=0.75, gamma=2.0):
    """Pure-JAX reference matching the torch module (BCE log clamp at -100)."""
    p = pred_score.astype(jnp.float32)
    g = gt_score.astype(jnp.float32)
    lb = label.astype(jnp.float32)
    weight = alpha * jnp.power(p, gamma) * (1.0 - lb) + g * lb
    bce = -(g * jnp.maximum(jnp.log(p), -100.0)
            + (1.0 - g) * jnp.maximum(jnp.log(1.0 - p), -100.0))
    return jnp.sum(bce * weight)


if __name__ == "__main__":
    B, L, C = 2, 64, 8
    key = jax.random.PRNGKey(0)
    k1, k2, k3 = jax.random.split(key, 3)

    pred_score = jax.random.uniform(k1, (B, L, C), minval=0.01, maxval=0.99,
                                    dtype=jnp.float32)
    gt_score = jax.random.uniform(k2, (B, L, C), minval=0.0, maxval=1.0,
                                  dtype=jnp.float32)
    label = jax.random.bernoulli(k3, 0.3, (B, L, C)).astype(jnp.float32)

    loss_fn = jax.jit(functools.partial(varifocal_loss, alpha=0.75, gamma=2.0))
    loss = loss_fn(pred_score, gt_score, label)
    jax.block_until_ready(loss)

    ref = varifocal_loss_ref(pred_score, gt_score, label)
    assert jnp.allclose(loss, ref, rtol=1e-4, atol=1e-4), (loss, ref)

    print("KERNEL_OK")
</pallas_src>

<mosaic_0001>
module attributes {stable_mosaic.version = 11 : i64} {
  func.func @_vfl_kernel(%arg0: i32, %arg1: i32, %arg2: memref<8x128xf32, #tpu.memory_space<vmem>>, %arg3: memref<8x128xf32, #tpu.memory_space<vmem>>, %arg4: memref<8x128xf32, #tpu.memory_space<vmem>>, %arg5: memref<8x128xf32, #tpu.memory_space<vmem>>) attributes {dimension_semantics = [#tpu.dimension_semantics<parallel>, #tpu.dimension_semantics<arbitrary>], iteration_bounds = array<i64: 2, 1>, scalar_prefetch = 0 : i64, scratch_operands = 0 : i64, tpu.core_type = #tpu.core_type<tc>, window_params = [{transform_indices = @transform_0, window_bounds = array<i64: 8, 128>}, {transform_indices = @transform_1, window_bounds = array<i64: 8, 128>}, {transform_indices = @transform_2, window_bounds = array<i64: 8, 128>}, {transform_indices = @transform_3, window_bounds = array<i64: 8, 128>}]} {
    %c0_i32 = arith.constant 0 : i32
    %0 = arith.cmpi eq, %arg1, %c0_i32 : i32
    %1 = arith.extui %0 : i1 to i32
    %c0_i32_0 = arith.constant 0 : i32
    %2 = arith.cmpi ne, %1, %c0_i32_0 : i32
    scf.if %2 {
      %cst_19 = arith.constant 0.000000e+00 : f32
      %44 = vector.broadcast %cst_19 : f32 to vector<8x128xf32>
      %c0_20 = arith.constant 0 : index
      %c0_21 = arith.constant 0 : index
      %45 = vector.load %arg5[%c0_20, %c0_21] : memref<8x128xf32, #tpu.memory_space<vmem>>, vector<8x128xf32>
      tpu.vector_store %arg5[%c0_20, %c0_21], %44 {strides = array<i32>} : memref<8x128xf32, #tpu.memory_space<vmem>>, vector<8x128xf32>,
    } else {
    }
    %c0 = arith.constant 0 : index
    %c0_1 = arith.constant 0 : index
    %3 = vector.load %arg2[%c0, %c0_1] : memref<8x128xf32, #tpu.memory_space<vmem>>, vector<8x128xf32>
    %c0_2 = arith.constant 0 : index
    %c0_3 = arith.constant 0 : index
    %4 = vector.load %arg3[%c0_2, %c0_3] : memref<8x128xf32, #tpu.memory_space<vmem>>, vector<8x128xf32>
    %c0_4 = arith.constant 0 : index
    %c0_5 = arith.constant 0 : index
    %5 = vector.load %arg4[%c0_4, %c0_5] : memref<8x128xf32, #tpu.memory_space<vmem>>, vector<8x128xf32>
    %6 = math.log %3 : vector<8x128xf32>
    %7 = arith.mulf %3, %3 : vector<8x128xf32>
    %cst = arith.constant 7.500000e-01 : f32
    %8 = vector.broadcast %cst : f32 to vector<8x128xf32>
    %9 = arith.mulf %8, %7 : vector<8x128xf32>
    %cst_6 = arith.constant 1.000000e+00 : f32
    %10 = vector.broadcast %cst_6 : f32 to vector<8x128xf32>
    %11 = arith.subf %10, %5 : vector<8x128xf32>
    %12 = arith.mulf %9, %11 : vector<8x128xf32>
    %13 = arith.mulf %4, %5 : vector<8x128xf32>
    %14 = arith.addf %12, %13 : vector<8x128xf32>
    %cst_7 = arith.constant -1.000000e+02 : f32
    %15 = vector.broadcast %cst_7 : f32 to vector<8x128xf32>
    %16 = arith.maximumf %6, %15 : vector<8x128xf32>
    %cst_8 = arith.constant 1.000000e+00 : f32
    %17 = vector.broadcast %cst_8 : f32 to vector<8x128xf32>
    %18 = arith.subf %17, %3 : vector<8x128xf32>
    %19 = math.log %18 : vector<8x128xf32>
    %cst_9 = arith.constant -1.000000e+02 : f32
    %20 = vector.broadcast %cst_9 : f32 to vector<8x128xf32>
    %21 = arith.maximumf %19, %20 : vector<8x128xf32>
    %22 = arith.mulf %4, %16 : vector<8x128xf32>
    %cst_10 = arith.constant 1.000000e+00 : f32
    %23 = vector.broadcast %cst_10 : f32 to vector<8x128xf32>
    %24 = arith.subf %23, %4 : vector<8x128xf32>
    %25 = arith.mulf %24, %21 : vector<8x128xf32>
    %26 = arith.addf %22, %25 : vector<8x128xf32>
    %cst_11 = arith.constant 0.000000e+00 : f32
    %27 = vector.broadcast %cst_11 : f32 to vector<8x128xf32>
    %28 = arith.subf %27, %26 : vector<8x128xf32>
    %29 = arith.mulf %28, %14 : vector<8x128xf32>
    %30 = tpu.iota {dimensions = array<i32: 0>} : vector<8x128xi32>
    %c1_i32 = arith.constant 1 : i32
    %31 = arith.muli %arg0, %c1_i32 : i32
    %32 = arith.addi %31, %arg1 : i32
    %c8_i32 = arith.constant 8 : i32
    %33 = arith.muli %32, %c8_i32 : i32
    %c8_i32_12 = arith.constant 8 : i32
    %34 = arith.subi %c8_i32_12, %33 : i32
    %35 = vector.broadcast %34 : i32 to vector<8x128xi32>
    %36 = arith.cmpi slt, %30, %35 : vector<8x128xi32>
    %cst_13 = arith.constant 0.000000e+00 : f32
    %37 = vector.broadcast %cst_13 : f32 to vector<8x128xf32>
    %38 = arith.select %36, %29, %37 : vector<8x128xi1>, vector<8x128xf32>
    %c0_14 = arith.constant 0 : index
    %c0_15 = arith.constant 0 : index
    %39 = vector.load %arg5[%c0_14, %c0_15] : memref<8x128xf32, #tpu.memory_space<vmem>>, vector<8x128xf32>
    %40 = vector.shape_cast %38 : vector<8x128xf32> to vector<1x8x128xf32>
    %cst_16 = arith.constant dense<0.000000e+00> : vector<8x128xf32>
    %41 = vector.multi_reduction <add>, %40, %cst_16 [0] : vector<1x8x128xf32> to vector<8x128xf32>
    %42 = arith.addf %39, %41 : vector<8x128xf32>
    %c0_17 = arith.constant 0 : index
    %c0_18 = arith.constant 0 : index
    %43 = vector.load %arg5[%c0_17, %c0_18] : memref<8x128xf32, #tpu.memory_space<vmem>>, vector<8x128xf32>
    tpu.vector_store %arg5[%c0_17, %c0_18], %42 {strides = array<i32>} : memref<8x128xf32, #tpu.memory_space<vmem>>, vector<8x128xf32>,
    return
  }
  func.func @transform_0(%arg0: i32, %arg1: i32) -> (i32, i32) {
    %c1_i32 = arith.constant 1 : i32
    %0 = arith.muli %arg0, %c1_i32 : i32
    %1 = arith.addi %0, %arg1 : i32
    %c0_i32 = arith.constant 0 : i32
    %2 = arith.minsi %1, %c0_i32 : i32
    %c0_i32_0 = arith.constant 0 : i32
    %c0_i32_1 = arith.constant 0 : i32
    return %2, %c0_i32_0 : i32, i32
  }
  func.func @transform_1(%arg0: i32, %arg1: i32) -> (i32, i32) {
    %c1_i32 = arith.constant 1 : i32
    %0 = arith.muli %arg0, %c1_i32 : i32
    %1 = arith.addi %0, %arg1 : i32
    %c0_i32 = arith.constant 0 : i32
    %2 = arith.minsi %1, %c0_i32 : i32
    %c0_i32_0 = arith.constant 0 : i32
    %c0_i32_1 = arith.constant 0 : i32
    return %2, %c0_i32_0 : i32, i32
  }
  func.func @transform_2(%arg0: i32, %arg1: i32) -> (i32, i32) {
    %c1_i32 = arith.constant 1 : i32
    %0 = arith.muli %arg0, %c1_i32 : i32
    %1 = arith.addi %0, %arg1 : i32
    %c0_i32 = arith.constant 0 : i32
    %2 = arith.minsi %1, %c0_i32 : i32
    %c0_i32_0 = arith.constant 0 : i32
    %c0_i32_1 = arith.constant 0 : i32
    return %2, %c0_i32_0 : i32, i32
  }
  func.func @transform_3(%arg0: i32, %arg1: i32) -> (i32, i32) {
    %c0_i32 = arith.constant 0 : i32
    %c0_i32_0 = arith.constant 0 : i32
    return %arg0, %c0_i32 : i32, i32
  }
}

</mosaic_0001>

<bundles_post_ra>
// kernel: varifocal_loss.1
= control target key start
LH: loop header
LB: loop body
LE: loop exit
PB: predicated region body
PF: predicated region fallthrough
CT: control target
= control target key end

     0   :  { %s493_s12 = smov 0   ;;  %s495_s13 = smov 0   ;;  %s539_s0 = inlined_call_operand.vmem [shape: f32[8,128], index: 0, kind: input, shape index: {}]   ;;  %s540_s1 = inlined_call_operand.vmem [shape: f32[8,128], index: 1, kind: input, shape index: {}]   ;;  %s541_s2 = inlined_call_operand.vmem [shape: f32[8,128], index: 2, kind: input, shape index: {}]   ;;  %s542_s3 = inlined_call_operand.vmem [shape: f32[16,128], index: 3, kind: output, shape index: {}]  }
   0x1   :  { %s497_s14 = smov 0  }
   0x2 LB: > { %s25_s15 = sadd.s32 1, %s467_s13  ;;  %p403_p0 = scmp.ge.s32.totalorder %s471_s14, 1  ;;  %s471_s14 = sphi %s497_s14, %s13_s14   ;;  %s467_s13 = sphi %s495_s13, %s544_s13   ;;  %s463_s12 = sphi %s493_s12, %s543_s12  }
   0x3   : > { %p27_p1 = scmp.ge.s32.totalorder %s25_s15, 2  ;;  %p202_p2 = scmp.lt.s32.totalorder %s471_s14, 3 }
   0x5   : > { %s546_s15 = smov (%p27_p1, %s25_s15), 0  ;;  %p203_p3 = pnand %p403_p0, %p202_p2 }
   0x6   : > { %p242_p4 = scmp.lt.s32.totalorder (!%p203_p3), %s463_s12, 0  ;;  %s417_s27 = sshll.u32 (!%p203_p3), %s463_s12, 3  ;;  %v302_v13 = vlaneseq (!%p203_p3) }
   0x7   : > { %206 = sbr.rel (%p203_p3) target bundleno = 47 (0x2f), region = 32  ;;  %p271_p5 = scmp.lt.s32.totalorder (!%p203_p3), %s463_s12, 1 }
   0x8   : > { %s306_s28 = ssub.s32 (!%p203_p3), 8, %s417_s27  ;;  %v303_v19 = vshrl.u32 (!%p203_p3), %v302_v13, 7 }
   0x9   : > { %v307_v22 = vstv (!%p203_p3), %s306_s28 }
   0xa   : > { %vm308_vm0 = vcmp.lt.s32.totalorder (!%p203_p3), %v303_v19, %v307_v22 }
   0xe   : > { %s243_s16 = scalar_select %p242_p4, %s463_s12, 0 }
   0xf   : > { %s550_s12 = smov (!%p271_p5, %s463_s12), 1 }
  0x10   : > { %s548_s16 = smov (!%p242_p4, %s243_s16), 0  ;;  %s416_s29 = sshll.u32 %s550_s12, 3 }
  0x11   : > { %s407_s17 = sshll.u32 %s548_s16, 3  ;;  %s274_s5 = scalar_lea.vmem %s542_s3, %s416_s29 }
  0x12   : > { %s247_s20 = scalar_lea.vmem %s539_s0, %s407_s17  ;;  %s267_s23 = scalar_lea.vmem %s541_s2, %s407_s17 }
  0x13   : > { %v280_v0 = vld [vmem:[%s247_s20] sm:$0xff]  ;;  %s257_s26 = scalar_lea.vmem %s540_s1, %s407_s17 }
  0x14   : > { %445 = vlog2.f32 %v280_v0  ;;  %v292_v1 = vsub.f32 1.0, %v280_v0  ;;  %v285_v2 = vmul.f32 %v280_v0, %v280_v0  ;;  %v282_v3 = vld [vmem:[%s267_s23] sm:$0xff] }
  0x15   : > { %v281_v5 = vld [vmem:[%s257_s26] sm:$0xff]  ;;  %v287_v8 = vsub.f32 1.0, %v282_v3 }
  0x16   : > { %447 = vlog2.f32 %v292_v1  ;;  %v286_v7 = vmul.f32 0.75, %v285_v2  ;;  %v297_v12 = vsub.f32 1.0, %v281_v5  ;;  %v289_v15 = vmul.f32 %v282_v3, %v281_v5 }
  0x18   : > { %v288_v14 = vmul.f32 %v287_v8, %v286_v7 }
  0x1a   : > { %v290_v20 = vadd.f32 %v289_v15, %v288_v14 }
  0x1e   : > { %v446_v4 = vpop.eup %445 }
  0x1f   : > { %v284_v6 = vmul.f32 0.6931472, %v446_v4 }
  0x20   : > { %v448_v9 = vpop.eup %447 }
  0x21   : > { %v291_v10 = vmax.f32 %v284_v6, -100.0  ;;  %v294_v11 = vmul.f32 0.6931472, %v448_v9 }
  0x23   : > { %v295_v16 = vmax.f32 %v294_v11, -100.0  ;;  %v296_v17 = vmul.f32 %v291_v10, %v281_v5 }
  0x25   : > { %v298_v18 = vmul.f32 %v297_v12, %v295_v16 }
  0x27   : > { %v299_v21 = vadd.f32 %v298_v18, %v296_v17 }
  0x29   : > { %v300_v23 = vsub.f32 0.0, %v299_v21 }
  0x2b   : > { %v301_v24 = vmul.f32 %v300_v23, %v290_v20 }
  0x2d   : > { %v309_v25 = vsel %vm308_vm0, %v301_v24, 0.0 }
  0x2e   : > { %313 = vst [vmem:[%s274_s5] sm:$0xff] %v309_v25 }
  0x2f PF: > { %s13_s14 = sadd.s32 1, %s471_s14   ;;  %s543_s12 = smov %s467_s13 }
  0x30   : > { %p10_p6 = scmp.ge.s32.totalorder %s13_s14, 4   ;;  %s544_s13 = smov %s546_s15 }
  0x32   :  { %12 = sbr.rel (!%p10_p6) target bundleno = 2 (0x2), region = 72 }

</bundles_post_ra>
